<compile_context>
chip_gen: v6e
topology: v6e:2x2x1
jax: 0.10.0
libtpu: 0.0.40
codegen_flags: <defaults>
</compile_context>

<pallas_src>
import jax
import jax.numpy as jnp
from jax.experimental import pallas as pl
from jax.experimental.pallas import tpu as pltpu


def _lpu_kernel(x_ref, w_ref, b_ref, o_ref):
    # x_ref: (1, H, W, Cb)  input slab (channel-last)
    # w_ref: (9, Cb)        depthwise taps, row k = (dh+1)*3 + (dw+1)
    # b_ref: (1, Cb)        bias
    # o_ref: (1, H, W, Cb)  output slab
    x = x_ref[0].astype(jnp.float32)              # (H, W, Cb)
    H, W, Cb = x.shape

    def w(k):                                     # per-lane weight vector
        return w_ref[k].astype(jnp.float32)       # (Cb,)

    b = b_ref[0].astype(jnp.float32)              # (Cb,)

    # H-direction halo: tile-aligned slices along the (untiled) major H axis.
    zrow = jnp.zeros((1, W, Cb), jnp.float32)
    row_next = jnp.concatenate([x[1:], zrow], axis=0)   # src row i+1 (0 past bottom)
    row_prev = jnp.concatenate([zrow, x[:-1]], axis=0)  # src row i-1 (0 past top)

    # dw == 0 taps; residual folded into center tap, bias seeds the accumulator.
    acc = row_prev * w(1) + x * (w(4) + 1.0) + row_next * w(7) + b

    # W-direction halo: sum the three taps sharing a shift, then one XLU roll
    # + one masked select per direction.
    col = jax.lax.broadcasted_iota(jnp.int32, (H, W, Cb), 1)

    sum_p1 = row_prev * w(2) + x * w(5) + row_next * w(8)   # sources at col j+1
    acc = acc + jnp.where(col < W - 1,
                          pltpu.roll(sum_p1, W - 1, axis=1), 0.0)

    sum_m1 = row_prev * w(0) + x * w(3) + row_next * w(6)   # sources at col j-1
    acc = acc + jnp.where(col > 0,
                          pltpu.roll(sum_m1, 1, axis=1), 0.0)

    o_ref[0] = acc.astype(o_ref.dtype)


def lpu_forward_nhwc(x, weight, bias):
    """Core kernel. x: (B, H, W, C) channel-last; weight: (C, 3, 3); bias: (C,)."""
    B, H, W, C = x.shape

    # Channel blocking: 128-lane blocks when C is large, full C otherwise
    # (a block equal to the full array dim is always legal).
    if C >= 128:
        c_blk = 128
        c_pad = pl.cdiv(C, 128) * 128
    else:
        c_blk = C
        c_pad = C

    w9 = jnp.transpose(weight.reshape(C, 9), (1, 0))   # (9, C): row k = tap k
    b1 = bias.reshape(1, C)
    if c_pad != C:
        x = jnp.pad(x, ((0, 0), (0, 0), (0, 0), (0, c_pad - C)))
        w9 = jnp.pad(w9, ((0, 0), (0, c_pad - C)))
        b1 = jnp.pad(b1, ((0, 0), (0, c_pad - C)))

    out = pl.pallas_call(
        _lpu_kernel,
        out_shape=jax.ShapeDtypeStruct((B, H, W, c_pad), x.dtype),
        grid_spec=pltpu.PrefetchScalarGridSpec(
            num_scalar_prefetch=0,
            grid=(B, c_pad // c_blk),
            in_specs=[
                pl.BlockSpec((1, H, W, c_blk), lambda b, c: (b, 0, 0, c)),
                pl.BlockSpec((9, c_blk), lambda b, c: (0, c)),
                pl.BlockSpec((1, c_blk), lambda b, c: (0, c)),
            ],
            out_specs=pl.BlockSpec((1, H, W, c_blk), lambda b, c: (b, 0, 0, c)),
        ),
        compiler_params=pltpu.CompilerParams(
            dimension_semantics=("parallel", "parallel")),
    )(x, w9, b1)

    if c_pad != C:
        out = out[..., :C]
    return out


def lpu_forward(x, weight, bias):
    """NCHW wrapper matching the PyTorch module. x: (B, C, H, W).

    The boundary transposes are layout plumbing; in a channel-last pipeline
    they disappear entirely.
    """
    x_nhwc = jnp.transpose(x, (0, 2, 3, 1))
    out = lpu_forward_nhwc(x_nhwc, weight, bias)
    return jnp.transpose(out, (0, 3, 1, 2))


def _reference(x, weight, bias):
    # Depthwise conv via lax.conv_general_dilated (feature_group_count=C).
    B, C, H, W = x.shape
    w = weight.reshape(C, 1, 3, 3)  # (O, I/groups, kh, kw)
    y = jax.lax.conv_general_dilated(
        x, w, window_strides=(1, 1), padding=((1, 1), (1, 1)),
        dimension_numbers=("NCHW", "OIHW", "NCHW"),
        feature_group_count=C)
    return y + bias.reshape(1, C, 1, 1) + x


if __name__ == "__main__":
    B, C, H, W = 2, 4, 16, 16
    key = jax.random.PRNGKey(0)
    kx, kw, kb = jax.random.split(key, 3)

    x = jax.random.normal(kx, (B, C, H, W), dtype=jnp.float32)
    # Deterministic parameter init (matches nn.Conv2d shapes:
    # weight (C, 1, 3, 3) -> stored here as (C, 3, 3), bias (C,)).
    weight = jax.random.normal(kw, (C, 3, 3), dtype=jnp.float32) * 0.1
    bias = jax.random.normal(kb, (C,), dtype=jnp.float32) * 0.1

    out = lpu_forward(x, weight, bias)
    out = jax.block_until_ready(out)

    ref = _reference(x, weight, bias)
    assert out.shape == (B, C, H, W)
    assert jnp.allclose(out, ref, atol=1e-5, rtol=1e-5)
    print("KERNEL_OK")
</pallas_src>

<mosaic_0001>
module attributes {stable_mosaic.version = 11 : i64} {
  func.func @_lpu_kernel(%arg0: i32, %arg1: i32, %arg2: memref<1x16x16x4xf32, #tpu.memory_space<vmem>>, %arg3: memref<9x4xf32, #tpu.memory_space<vmem>>, %arg4: memref<1x4xf32, #tpu.memory_space<vmem>>, %arg5: memref<1x16x16x4xf32, #tpu.memory_space<vmem>>) attributes {dimension_semantics = [#tpu.dimension_semantics<parallel>, #tpu.dimension_semantics<parallel>], iteration_bounds = array<i64: 2, 1>, scalar_prefetch = 0 : i64, scratch_operands = 0 : i64, tpu.core_type = #tpu.core_type<tc>, window_params = [{transform_indices = @transform_0, window_bounds = array<i64: 1, 16, 16, 4>}, {transform_indices = @transform_1, window_bounds = array<i64: 9, 4>}, {transform_indices = @transform_2, window_bounds = array<i64: 1, 4>}, {transform_indices = @transform_3, window_bounds = array<i64: 1, 16, 16, 4>}]} {
    %c0 = arith.constant 0 : index
    %c0_0 = arith.constant 0 : index
    %c0_1 = arith.constant 0 : index
    %c0_2 = arith.constant 0 : index
    %0 = vector.load %arg2[%c0, %c0_0, %c0_1, %c0_2] : memref<1x16x16x4xf32, #tpu.memory_space<vmem>>, vector<1x16x16x4xf32>
    %1 = vector.shape_cast %0 : vector<1x16x16x4xf32> to vector<16x16x4xf32>
    %c0_3 = arith.constant 0 : index
    %c0_4 = arith.constant 0 : index
    %2 = vector.load %arg4[%c0_3, %c0_4] : memref<1x4xf32, #tpu.memory_space<vmem>>, vector<1x4xf32>
    %3 = vector.shape_cast %2 : vector<1x4xf32> to vector<4xf32>
    %cst = arith.constant 0.000000e+00 : f32
    %4 = vector.broadcast %cst : f32 to vector<1x16x4xf32>
    %5 = vector.extract_strided_slice %1 {offsets = [1, 0, 0], sizes = [15, 16, 4], strides = [1, 1, 1]} : vector<16x16x4xf32> to vector<15x16x4xf32>
    %6 = tpu.concatenate %5, %4 in 0 : vector<15x16x4xf32>, vector<1x16x4xf32> -> vector<16x16x4xf32>
    %7 = vector.extract_strided_slice %1 {offsets = [0, 0, 0], sizes = [15, 16, 4], strides = [1, 1, 1]} : vector<16x16x4xf32> to vector<15x16x4xf32>
    %8 = tpu.concatenate %4, %7 in 0 : vector<1x16x4xf32>, vector<15x16x4xf32> -> vector<16x16x4xf32>
    %c1 = arith.constant 1 : index
    %c0_5 = arith.constant 0 : index
    %9 = vector.load %arg3[%c1, %c0_5] : memref<9x4xf32, #tpu.memory_space<vmem>>, vector<1x4xf32>
    %10 = vector.shape_cast %9 : vector<1x4xf32> to vector<4xf32>
    %11 = vector.shape_cast %10 : vector<4xf32> to vector<1x1x4xf32>
    %12 = vector.broadcast %11 : vector<1x1x4xf32> to vector<16x16x4xf32>
    %13 = arith.mulf %8, %12 : vector<16x16x4xf32>
    %c4 = arith.constant 4 : index
    %c0_6 = arith.constant 0 : index
    %14 = vector.load %arg3[%c4, %c0_6] : memref<9x4xf32, #tpu.memory_space<vmem>>, vector<1x4xf32>
    %15 = vector.shape_cast %14 : vector<1x4xf32> to vector<4xf32>
    %cst_7 = arith.constant 1.000000e+00 : f32
    %16 = vector.broadcast %cst_7 : f32 to vector<4xf32>
    %17 = arith.addf %15, %16 : vector<4xf32>
    %18 = vector.shape_cast %17 : vector<4xf32> to vector<1x1x4xf32>
    %19 = vector.broadcast %18 : vector<1x1x4xf32> to vector<16x16x4xf32>
    %20 = arith.mulf %1, %19 : vector<16x16x4xf32>
    %21 = arith.addf %13, %20 : vector<16x16x4xf32>
    %c7 = arith.constant 7 : index
    %c0_8 = arith.constant 0 : index
    %22 = vector.load %arg3[%c7, %c0_8] : memref<9x4xf32, #tpu.memory_space<vmem>>, vector<1x4xf32>
    %23 = vector.shape_cast %22 : vector<1x4xf32> to vector<4xf32>
    %24 = vector.shape_cast %23 : vector<4xf32> to vector<1x1x4xf32>
    %25 = vector.broadcast %24 : vector<1x1x4xf32> to vector<16x16x4xf32>
    %26 = arith.mulf %6, %25 : vector<16x16x4xf32>
    %27 = arith.addf %21, %26 : vector<16x16x4xf32>
    %28 = vector.shape_cast %3 : vector<4xf32> to vector<1x1x4xf32>
    %29 = vector.broadcast %28 : vector<1x1x4xf32> to vector<16x16x4xf32>
    %30 = arith.addf %27, %29 : vector<16x16x4xf32>
    %31 = tpu.iota {dimensions = array<i32: 1>} : vector<16x16x4xi32>
    %c2 = arith.constant 2 : index
    %c0_9 = arith.constant 0 : index
    %32 = vector.load %arg3[%c2, %c0_9] : memref<9x4xf32, #tpu.memory_space<vmem>>, vector<1x4xf32>
    %33 = vector.shape_cast %32 : vector<1x4xf32> to vector<4xf32>
    %34 = vector.shape_cast %33 : vector<4xf32> to vector<1x1x4xf32>
    %35 = vector.broadcast %34 : vector<1x1x4xf32> to vector<16x16x4xf32>
    %36 = arith.mulf %8, %35 : vector<16x16x4xf32>
    %c5 = arith.constant 5 : index
    %c0_10 = arith.constant 0 : index
    %37 = vector.load %arg3[%c5, %c0_10] : memref<9x4xf32, #tpu.memory_space<vmem>>, vector<1x4xf32>
    %38 = vector.shape_cast %37 : vector<1x4xf32> to vector<4xf32>
    %39 = vector.shape_cast %38 : vector<4xf32> to vector<1x1x4xf32>
    %40 = vector.broadcast %39 : vector<1x1x4xf32> to vector<16x16x4xf32>
    %41 = arith.mulf %1, %40 : vector<16x16x4xf32>
    %42 = arith.addf %36, %41 : vector<16x16x4xf32>
    %c8 = arith.constant 8 : index
    %c0_11 = arith.constant 0 : index
    %43 = vector.load %arg3[%c8, %c0_11] : memref<9x4xf32, #tpu.memory_space<vmem>>, vector<1x4xf32>
    %44 = vector.shape_cast %43 : vector<1x4xf32> to vector<4xf32>
    %45 = vector.shape_cast %44 : vector<4xf32> to vector<1x1x4xf32>
    %46 = vector.broadcast %45 : vector<1x1x4xf32> to vector<16x16x4xf32>
    %47 = arith.mulf %6, %46 : vector<16x16x4xf32>
    %48 = arith.addf %42, %47 : vector<16x16x4xf32>
    %c15_i32 = arith.constant 15 : i32
    %49 = vector.broadcast %c15_i32 : i32 to vector<16x16x4xi32>
    %50 = arith.cmpi slt, %31, %49 : vector<16x16x4xi32>
    %c15_i32_12 = arith.constant 15 : i32
    %51 = tpu.dynamic_rotate %48 by %c15_i32_12 dim 1 : vector<16x16x4xf32>, i32 -> vector<16x16x4xf32>
    %cst_13 = arith.constant 0.000000e+00 : f32
    %52 = vector.broadcast %cst_13 : f32 to vector<16x16x4xf32>
    %53 = arith.select %50, %51, %52 : vector<16x16x4xi1>, vector<16x16x4xf32>
    %54 = arith.addf %30, %53 : vector<16x16x4xf32>
    %c0_14 = arith.constant 0 : index
    %c0_15 = arith.constant 0 : index
    %55 = vector.load %arg3[%c0_14, %c0_15] : memref<9x4xf32, #tpu.memory_space<vmem>>, vector<1x4xf32>
    %56 = vector.shape_cast %55 : vector<1x4xf32> to vector<4xf32>
    %57 = vector.shape_cast %56 : vector<4xf32> to vector<1x1x4xf32>
    %58 = vector.broadcast %57 : vector<1x1x4xf32> to vector<16x16x4xf32>
    %59 = arith.mulf %8, %58 : vector<16x16x4xf32>
    %c3 = arith.constant 3 : index
    %c0_16 = arith.constant 0 : index
    %60 = vector.load %arg3[%c3, %c0_16] : memref<9x4xf32, #tpu.memory_space<vmem>>, vector<1x4xf32>
    %61 = vector.shape_cast %60 : vector<1x4xf32> to vector<4xf32>
    %62 = vector.shape_cast %61 : vector<4xf32> to vector<1x1x4xf32>
    %63 = vector.broadcast %62 : vector<1x1x4xf32> to vector<16x16x4xf32>
    %64 = arith.mulf %1, %63 : vector<16x16x4xf32>
    %65 = arith.addf %59, %64 : vector<16x16x4xf32>
    %c6 = arith.constant 6 : index
    %c0_17 = arith.constant 0 : index
    %66 = vector.load %arg3[%c6, %c0_17] : memref<9x4xf32, #tpu.memory_space<vmem>>, vector<1x4xf32>
    %67 = vector.shape_cast %66 : vector<1x4xf32> to vector<4xf32>
    %68 = vector.shape_cast %67 : vector<4xf32> to vector<1x1x4xf32>
    %69 = vector.broadcast %68 : vector<1x1x4xf32> to vector<16x16x4xf32>
    %70 = arith.mulf %6, %69 : vector<16x16x4xf32>
    %71 = arith.addf %65, %70 : vector<16x16x4xf32>
    %c0_i32 = arith.constant 0 : i32
    %72 = vector.broadcast %c0_i32 : i32 to vector<16x16x4xi32>
    %73 = arith.cmpi sgt, %31, %72 : vector<16x16x4xi32>
    %c1_i32 = arith.constant 1 : i32
    %74 = tpu.dynamic_rotate %71 by %c1_i32 dim 1 : vector<16x16x4xf32>, i32 -> vector<16x16x4xf32>
    %cst_18 = arith.constant 0.000000e+00 : f32
    %75 = vector.broadcast %cst_18 : f32 to vector<16x16x4xf32>
    %76 = arith.select %73, %74, %75 : vector<16x16x4xi1>, vector<16x16x4xf32>
    %77 = arith.addf %54, %76 : vector<16x16x4xf32>
    %c0_19 = arith.constant 0 : index
    %c0_20 = arith.constant 0 : index
    %c0_21 = arith.constant 0 : index
    %c0_22 = arith.constant 0 : index
    %78 = vector.load %arg5[%c0_19, %c0_20, %c0_21, %c0_22] : memref<1x16x16x4xf32, #tpu.memory_space<vmem>>, vector<1x16x16x4xf32>
    %79 = vector.shape_cast %78 : vector<1x16x16x4xf32> to vector<16x16x4xf32>
    %80 = vector.shape_cast %77 : vector<16x16x4xf32> to vector<1x16x16x4xf32>
    tpu.vector_store %arg5[%c0_19, %c0_20, %c0_21, %c0_22], %80 {strides = array<i32>} : memref<1x16x16x4xf32, #tpu.memory_space<vmem>>, vector<1x16x16x4xf32>,
    return
  }
  func.func @transform_0(%arg0: i32, %arg1: i32) -> (i32, i32, i32, i32) {
    %c0_i32 = arith.constant 0 : i32
    %c0_i32_0 = arith.constant 0 : i32
    %c0_i32_1 = arith.constant 0 : i32
    return %arg0, %c0_i32, %c0_i32_0, %arg1 : i32, i32, i32, i32
  }
  func.func @transform_1(%arg0: i32, %arg1: i32) -> (i32, i32) {
    %c0_i32 = arith.constant 0 : i32
    %c0_i32_0 = arith.constant 0 : i32
    return %c0_i32, %arg1 : i32, i32
  }
  func.func @transform_2(%arg0: i32, %arg1: i32) -> (i32, i32) {
    %c0_i32 = arith.constant 0 : i32
    %c0_i32_0 = arith.constant 0 : i32
    return %c0_i32, %arg1 : i32, i32
  }
  func.func @transform_3(%arg0: i32, %arg1: i32) -> (i32, i32, i32, i32) {
    %c0_i32 = arith.constant 0 : i32
    %c0_i32_0 = arith.constant 0 : i32
    %c0_i32_1 = arith.constant 0 : i32
    return %arg0, %c0_i32, %c0_i32_0, %arg1 : i32, i32, i32, i32
  }
}

</mosaic_0001>

<bundles_post_ra>
// kernel: tpu_custom_call.1
= control target key start
LH: loop header
LB: loop body
LE: loop exit
PB: predicated region body
PF: predicated region fallthrough
CT: control target
= control target key end

     0   :  { %s1334_s12 = smov 0   ;;  %s1336_s13 = smov 0   ;;  %s2425_s0 = inlined_call_operand.vmem [shape: f32[2,16,16,4], index: 0, kind: input, shape index: {}]   ;;  %s2426_s1 = inlined_call_operand.vmem [shape: f32[9,4], index: 1, kind: input, shape index: {}]   ;;  %s2427_s2 = inlined_call_operand.vmem [shape: f32[1,4], index: 2, kind: input, shape index: {}]   ;;  %s2428_s3 = inlined_call_operand.vmem [shape: f32[2,16,16,4], index: 3, kind: output, shape index: {}]  }
   0x1   :  { %s1338_s14 = smov 0  }
   0x2 LB: > { %s25_s15 = sadd.s32 1, %s1308_s13  ;;  %p1239_p0 = scmp.ge.s32.totalorder %s1312_s14, 1  ;;  %s1312_s14 = sphi %s1338_s14, %s13_s14   ;;  %s1308_s13 = sphi %s1336_s13, %s2430_s13   ;;  %s1304_s12 = sphi %s1334_s12, %s2429_s12  }
   0x3   : > { %p27_p1 = scmp.ge.s32.totalorder %s25_s15, 2  ;;  %p173_p2 = scmp.lt.s32.totalorder %s1312_s14, 3 }
   0x5   : > { %s2432_s15 = smov (%p27_p1, %s25_s15), 0  ;;  %p174_p3 = pnand %p1239_p0, %p173_p2 }
   0x6   : > { %p210_p4 = scmp.lt.s32.totalorder (!%p174_p3), %s1304_s12, 1 }
   0x7   : > { %177 = sbr.rel (%p174_p3) target bundleno = 207 (0xcf), region = 32 }
   0xc   : > { %v1355_v0 = vld [vmem:[%s2426_s1 + $0x1] ss:$0 sm:$0xff]  ;;  %v304_v1 = vlaneseq  ;;  %v302_v2 = vld [vmem:[%s2426_s1 + $0x4] sm:$0x1]  ;;  %s2434_s12 = smov (!%p210_p4, %s1304_s12), 1  ;;  %vm1089_vm3 = vcmask 31744  }
   0xd   : > { %v303_v3 = vadd.f32 1.0, %v302_v2  ;;  %v1367_v5 = vld [vmem:[%s2426_s1 + $0x2] ss:$0 sm:$0xff]  ;;  %v271_v6 = vmul.f32 0.0, %v1355_v0  ;;  %v1373_v7 = vld [vmem:[%s2426_s1 + $0x7] ss:$0 sm:$0xff] }
   0xe   : > { %v1362_v4 = vshrl.u32 %v304_v1, 7  ;;  %v1378_v8 = vld [vmem:[%s2426_s1 + $0x5] ss:$0 sm:$0xff]  ;;  %s1255_s26 = sshll.u32 %s2434_s12, 8  ;;  %v1385_v10 = vld [vmem:[%s2426_s1 + $0x8] ss:$0 sm:$0xff] }
   0xf   : > { %v1390_v11 = vld [vmem:[%s2426_s1] ss:$0 sm:$0xff]  ;;  %s1397_s6 = scalar_lea.vmem %s2425_s0, %s1255_s26  ;;  %v486_v12 = vmul.f32 0.0, %v1367_v5  ;;  %v1404_v13 = vld [vmem:[%s2426_s1 + $0x3] ss:$0 sm:$0xff]  ;;  %s1485_s19 = scalar_lea.vmem %s2428_s3, %s1255_s26 }
  0x10   : > { %v306_v9 = vsub.s32 0, %v1362_v4  ;;  %vm688_vm0 = vcmp.lt.s32.totalorder %v1362_v4, 7  ;;  %v1409_v14 = vld [vmem:[%s2426_s1 + $0x6] ss:$0 sm:$0xff]  ;;  %v1415_v16 = vld [vmem:[%s1397_s6 + $0x8] sm:$0xff]  ;;  %v1418_v17 = vld [vmem:[%s1397_s6 + $0x10] sm:$0xff] }
  0x11   : > { %v1412_v15 = vld [vmem:[%s1397_s6] sm:$0xff]  ;;  %v790_v19 = vmul.f32 0.0, %v1390_v11  ;;  %vm958_vm1 = vcmp.gt.s32.totalorder %v1362_v4, 0  ;;  %vm992_vm2 = vcmp.lt.s32.totalorder %v1362_v4, 1  ;;  %v1426_v20 = vadd.s32 8, %v1362_v4  ;;  %v1429_v21 = vld [vmem:[%s1397_s6 + $0x18] sm:$0xff] }
  0x12   : > { %v1420_v18 = vrot.slane %v303_v3, %v306_v9  ;;  %v377_v22 = vmul.f32 %v1373_v7, %v1418_v17  ;;  %v522_v23 = vmul.f32 %v1378_v8, %v1412_v15  ;;  %v523_v24 = vmul.f32 %v1378_v8, %v1415_v16  ;;  %v1456_v38 = vld [vmem:[%s2427_s2] ss:$0 sm:$0xff] }
  0x13   : > { %v591_v25 = vmul.f32 %v1385_v10, %v1418_v17  ;;  %v592_v27 = vmul.f32 %v1385_v10, %v1429_v21  ;;  %v826_v28 = vmul.f32 %v1404_v13, %v1412_v15  ;;  %v827_v29 = vmul.f32 %v1404_v13, %v1415_v16  ;;  %v1467_v54 = vld [vmem:[%s1397_s6 + $0x20] sm:$0xff] }
  0x14   : > { %v308_v26 = vmul.f32 %v1420_v18, %v1412_v15  ;;  %v554_v30 = vadd.f32 %v522_v23, %v486_v12  ;;  %v555_v31 = vadd.f32 %v523_v24, %v486_v12  ;;  %v895_v32 = vmul.f32 %v1409_v14, %v1418_v17  ;;  %v1494_v12 = vld [vmem:[%s1397_s6 + $0x28] sm:$0xff] }
  0x15   : > { %v896_v33 = vmul.f32 %v1409_v14, %v1429_v21  ;;  %v858_v35 = vadd.f32 %v826_v28, %v790_v19  ;;  %v859_v36 = vadd.f32 %v827_v29, %v790_v19  ;;  %v309_v37 = vmul.f32 %v1420_v18, %v1415_v16 }
  0x16   : > { %v340_v34 = vadd.f32 %v308_v26, %v271_v6  ;;  %v622_v39 = vadd.f32 %v591_v25, %v554_v30  ;;  %v623_v40 = vadd.f32 %v592_v27, %v555_v31  ;;  %v378_v41 = vmul.f32 %v1373_v7, %v1429_v21 }
  0x17   : > { %vm655_vm4 = vcmp.lt.s32.totalorder %v1426_v20, 15  ;;  %v926_v43 = vadd.f32 %v895_v32, %v858_v35  ;;  %v927_v44 = vadd.f32 %v896_v33, %v859_v36  ;;  %v341_v45 = vadd.f32 %v309_v37, %v271_v6 }
  0x18   : > { %v408_v42 = vadd.f32 %v377_v22, %v340_v34  ;;  %v656_v46 = vrot.slane %v622_v39, 1  ;;  %v672_v47 = vrot.slane %v623_v40, 1  ;;  %v272_v48 = vmul.f32 %v1355_v0, %v1412_v15 }
  0x19   : > { %v310_v49 = vmul.f32 %v1420_v18, %v1418_v17  ;;  %v960_v51 = vrot.slane %v926_v43, 7  ;;  %v976_v52 = vrot.slane %v927_v44, 7  ;;  %v409_v53 = vadd.f32 %v378_v41, %v341_v45  ;;  %v1530_v45 = vld [vmem:[%s1397_s6 + $0x30] sm:$0xff] }
  0x1a   : > { %v446_v50 = vadd.f32 %v1456_v38, %v408_v42  ;;  %v689_v55 = vsel %vm688_vm0, %v656_v46, %v672_v47  ;;  %v705_v56 = vsel %vm688_vm0, %v672_v47, %v656_v46  ;;  %v379_v58 = vmul.f32 %v1373_v7, %v1467_v54 }
  0x1b   : > { %v342_v57 = vadd.f32 %v310_v49, %v272_v48  ;;  %v1009_v60 = vsel %vm992_vm2, %v976_v52, %v960_v51  ;;  %v447_v61 = vadd.f32 %v1456_v38, %v409_v53  ;;  %v722_v62 = vsel %vm655_vm4, %v705_v56, 0.0 }
  0x1c   : > { %v753_v59 = vadd.f32 %v689_v55, %v446_v50  ;;  %v1025_v63 = vsel %vm958_vm1, %v1009_v60, 0.0  ;;  %v993_v1 = vsel %vm992_vm2, %v960_v51, %v976_v52  ;;  %v487_v3 = vmul.f32 %v1367_v5, %v1412_v15 }
  0x1d   : > { %v410_v2 = vadd.f32 %v379_v58, %v342_v57  ;;  %v754_v9 = vadd.f32 %v722_v62, %v447_v61  ;;  %v488_v19 = vmul.f32 %v1367_v5, %v1415_v16  ;;  %v524_v22 = vmul.f32 %v1378_v8, %v1418_v17 }
  0x1e   : > { %v1057_v6 = vadd.f32 %v1025_v63, %v753_v59  ;;  %v525_v24 = vmul.f32 %v1378_v8, %v1429_v21  ;;  %v593_v25 = vmul.f32 %v1385_v10, %v1467_v54  ;;  %v594_v26 = vmul.f32 %v1385_v10, %v1494_v12 }
  0x1f   : > { %v448_v23 = vadd.f32 %v1456_v38, %v410_v2  ;;  %v1058_v27 = vadd.f32 %v993_v1, %v754_v9  ;;  %v556_v28 = vadd.f32 %v524_v22, %v487_v3  ;;  %v791_v29 = vmul.f32 %v1390_v11, %v1412_v15  ;;  %v1560_v22 = vld [vmem:[%s1397_s6 + $0x38] sm:$0xff] }
  0x20   : > { %1090 = vst.msk [vmem:[%s1485_s19] sm:$0xff] %vm1089_vm3, %v1057_v6  ;;  %v792_v30 = vmul.f32 %v1390_v11, %v1415_v16  ;;  %v557_v31 = vadd.f32 %v525_v24, %v488_v19  ;;  %v828_v32 = vmul.f32 %v1404_v13, %v1418_v17  ;;  %v829_v33 = vmul.f32 %v1404_v13, %v1429_v21 }
  0x21   : > { %v897_v34 = vmul.f32 %v1409_v14, %v1467_v54  ;;  %1091 = vst.msk [vmem:[%s1485_s19 + $0x8] sm:$0xff] %vm1089_vm3, %v1058_v27  ;;  %v624_v35 = vadd.f32 %v593_v25, %v556_v28  ;;  %v898_v15 = vmul.f32 %v1409_v14, %v1494_v12  ;;  %v273_v36 = vmul.f32 %v1355_v0, %v1415_v16 }
  0x22   : > { %v311_v37 = vmul.f32 %v1420_v18, %v1429_v21  ;;  %v625_v39 = vadd.f32 %v594_v26, %v557_v31  ;;  %v860_v40 = vadd.f32 %v828_v32, %v791_v29  ;;  %v861_v41 = vadd.f32 %v829_v33, %v792_v30 }
  0x23   : > { %v380_v42 = vmul.f32 %v1373_v7, %v1494_v12  ;;  %v657_v43 = vrot.slane %v624_v35, 1  ;;  %v274_v46 = vmul.f32 %v1355_v0, %v1418_v17  ;;  %v312_v47 = vmul.f32 %v1420_v18, %v1467_v54 }
  0x24   : > { %v343_v44 = vadd.f32 %v311_v37, %v273_v36  ;;  %v673_v16 = vrot.slane %v625_v39, 1  ;;  %v928_v48 = vadd.f32 %v897_v34, %v860_v40  ;;  %v929_v49 = vadd.f32 %v898_v15, %v861_v41 }
  0x25   : > { %v381_v50 = vmul.f32 %v1373_v7, %v1530_v45  ;;  %v344_v52 = vadd.f32 %v312_v47, %v274_v46  ;;  %v489_v53 = vmul.f32 %v1367_v5, %v1418_v17  ;;  %v490_v55 = vmul.f32 %v1367_v5, %v1429_v21  ;;  %v1590_v47 = vld [vmem:[%s1397_s6 + $0x40] sm:$0xff] }
  0x26   : > { %v411_v51 = vadd.f32 %v380_v42, %v343_v44  ;;  %v690_v56 = vsel %vm688_vm0, %v657_v43, %v673_v16  ;;  %v961_v57 = vrot.slane %v928_v48, 7  ;;  %v977_v58 = vrot.slane %v929_v49, 7 }
  0x27   : > { %v706_v59 = vsel %vm688_vm0, %v673_v16, %v657_v43  ;;  %v755_v60 = vadd.f32 %v690_v56, %v448_v23  ;;  %v412_v63 = vadd.f32 %v381_v50, %v344_v52  ;;  %v526_v3 = vmul.f32 %v1378_v8, %v1467_v54 }
  0x28   : > { %v449_v61 = vadd.f32 %v1456_v38, %v411_v51  ;;  %v724_v62 = vsel %vm655_vm4, %v706_v59, 0.0  ;;  %v1010_v1 = vsel %vm992_vm2, %v977_v58, %v961_v57  ;;  %v994_v2 = vsel %vm992_vm2, %v961_v57, %v977_v58 }
  0x29   : > { %v527_v6 = vmul.f32 %v1378_v8, %v1494_v12  ;;  %v1027_v9 = vsel %vm958_vm1, %v1010_v1, 0.0  ;;  %v450_v23 = vadd.f32 %v1456_v38, %v412_v63  ;;  %v595_v24 = vmul.f32 %v1385_v10, %v1530_v45 }
  0x2a   : > { %v756_v19 = vadd.f32 %v724_v62, %v449_v61  ;;  %v1059_v25 = vadd.f32 %v1027_v9, %v755_v60  ;;  %v558_v26 = vadd.f32 %v526_v3, %v489_v53  ;;  %v596_v28 = vmul.f32 %v1385_v10, %v1560_v22  ;;  %v1610_v62 = vld [vmem:[%s1397_s6 + $0x48] sm:$0xff] }
  0x2b   : > { %v559_v27 = vadd.f32 %v527_v6, %v490_v55  ;;  %v793_v30 = vmul.f32 %v1390_v11, %v1418_v17  ;;  %v794_v31 = vmul.f32 %v1390_v11, %v1429_v21  ;;  %v830_v32 = vmul.f32 %v1404_v13, %v1467_v54 }
  0x2c   : > { %v1060_v29 = vadd.f32 %v994_v2, %v756_v19  ;;  %1092 = vst.msk [vmem:[%s1485_s19 + $0x10] sm:$0xff] %vm1089_vm3, %v1059_v25  ;;  %v626_v33 = vadd.f32 %v595_v24, %v558_v26  ;;  %v831_v35 = vmul.f32 %v1404_v13, %v1494_v12  ;;  %v899_v15 = vmul.f32 %v1409_v14, %v1530_v45 }
  0x2d   : > { %v627_v34 = vadd.f32 %v596_v28, %v559_v27  ;;  %v862_v17 = vadd.f32 %v830_v32, %v793_v30  ;;  %v900_v36 = vmul.f32 %v1409_v14, %v1560_v22  ;;  %v275_v37 = vmul.f32 %v1355_v0, %v1429_v21 }
  0x2e   : > { %1093 = vst.msk [vmem:[%s1485_s19 + $0x18] sm:$0xff] %vm1089_vm3, %v1060_v29  ;;  %v313_v39 = vmul.f32 %v1420_v18, %v1494_v12  ;;  %v658_v40 = vrot.slane %v626_v33, 1  ;;  %v863_v42 = vadd.f32 %v831_v35, %v794_v31  ;;  %v382_v43 = vmul.f32 %v1373_v7, %v1560_v22 }
  0x2f   : > { %v674_v41 = vrot.slane %v627_v34, 1  ;;  %v930_v44 = vadd.f32 %v899_v15, %v862_v17  ;;  %v276_v16 = vmul.f32 %v1355_v0, %v1467_v54  ;;  %v314_v21 = vmul.f32 %v1420_v18, %v1530_v45 }
  0x30   : > { %v345_v46 = vadd.f32 %v313_v39, %v275_v37  ;;  %v931_v49 = vadd.f32 %v900_v36, %v863_v42  ;;  %v383_v51 = vmul.f32 %v1373_v7, %v1590_v47  ;;  %v491_v59 = vmul.f32 %v1367_v5, %v1467_v54 }
  0x31   : > { %v691_v48 = vsel %vm688_vm0, %v658_v40, %v674_v41  ;;  %v707_v50 = vsel %vm688_vm0, %v674_v41, %v658_v40  ;;  %v962_v53 = vrot.slane %v930_v44, 7  ;;  %v346_v58 = vadd.f32 %v314_v21, %v276_v16 }
  0x32   : > { %v757_v52 = vadd.f32 %v691_v48, %v450_v23  ;;  %v413_v55 = vadd.f32 %v382_v43, %v345_v46  ;;  %v726_v56 = vsel %vm655_vm4, %v707_v50, 0.0  ;;  %v978_v57 = vrot.slane %v931_v49, 7 }
  0x33   : > { %v492_v60 = vmul.f32 %v1367_v5, %v1494_v12  ;;  %v528_v63 = vmul.f32 %v1378_v8, %v1530_v45  ;;  %v529_v1 = vmul.f32 %v1378_v8, %v1560_v22  ;;  %v597_v2 = vmul.f32 %v1385_v10, %v1590_v47 }
  0x34   : > { %v451_v61 = vadd.f32 %v1456_v38, %v413_v55  ;;  %v1011_v3 = vsel %vm992_vm2, %v978_v57, %v962_v53  ;;  %v995_v6 = vsel %vm992_vm2, %v962_v53, %v978_v57  ;;  %v414_v9 = vadd.f32 %v383_v51, %v346_v58  ;;  %v1660_v51 = vld [vmem:[%s1397_s6 + $0x50] sm:$0xff] }
  0x35   : > { %v598_v19 = vmul.f32 %v1385_v10, %v1610_v62  ;;  %v1029_v23 = vsel %vm958_vm1, %v1011_v3, 0.0  ;;  %v560_v25 = vadd.f32 %v528_v63, %v491_v59  ;;  %v561_v26 = vadd.f32 %v529_v1, %v492_v60  ;;  %v1667_v59 = vld [vmem:[%s1397_s6 + $0x58] sm:$0xff] }
  0x36   : > { %v758_v24 = vadd.f32 %v726_v56, %v451_v61  ;;  %v1061_v27 = vadd.f32 %v1029_v23, %v757_v52  ;;  %v452_v28 = vadd.f32 %v1456_v38, %v414_v9  ;;  %v795_v29 = vmul.f32 %v1390_v11, %v1467_v54 }
  0x37   : > { %v796_v30 = vmul.f32 %v1390_v11, %v1494_v12  ;;  %v628_v32 = vadd.f32 %v597_v2, %v560_v25  ;;  %v629_v33 = vadd.f32 %v598_v19, %v561_v26  ;;  %v832_v34 = vmul.f32 %v1404_v13, %v1530_v45 }
  0x38   : > { %v1062_v31 = vadd.f32 %v995_v6, %v758_v24  ;;  %1094 = vst.msk [vmem:[%s1485_s19 + $0x20] sm:$0xff] %vm1089_vm3, %v1061_v27  ;;  %v833_v35 = vmul.f32 %v1404_v13, %v1560_v22  ;;  %v901_v15 = vmul.f32 %v1409_v14, %v1590_v47  ;;  %v902_v54 = vmul.f32 %v1409_v14, %v1610_v62 }
  0x39   : > { %v277_v17 = vmul.f32 %v1355_v0, %v1494_v12  ;;  %v659_v36 = vrot.slane %v628_v32, 1  ;;  %v675_v37 = vrot.slane %v629_v33, 1  ;;  %v864_v39 = vadd.f32 %v832_v34, %v795_v29 }
  0x3a   : > { %1095 = vst.msk [vmem:[%s1485_s19 + $0x28] sm:$0xff] %vm1089_vm3, %v1062_v31  ;;  %v315_v40 = vmul.f32 %v1420_v18, %v1560_v22  ;;  %v865_v41 = vadd.f32 %v833_v35, %v796_v30  ;;  %v384_v42 = vmul.f32 %v1373_v7, %v1610_v62  ;;  %v278_v43 = vmul.f32 %v1355_v0, %v1530_v45 }
  0x3b   : > { %v316_v12 = vmul.f32 %v1420_v18, %v1590_v47  ;;  %v692_v44 = vsel %vm688_vm0, %v659_v36, %v675_v37  ;;  %v932_v46 = vadd.f32 %v901_v15, %v864_v39  ;;  %v708_v21 = vsel %vm688_vm0, %v675_v37, %v659_v36 }
  0x3c   : > { %v347_v16 = vadd.f32 %v315_v40, %v277_v17  ;;  %v759_v48 = vadd.f32 %v692_v44, %v452_v28  ;;  %v933_v49 = vadd.f32 %v902_v54, %v865_v41  ;;  %v728_v50 = vsel %vm655_vm4, %v708_v21, 0.0 }
  0x3d   : > { %v348_v52 = vadd.f32 %v316_v12, %v278_v43  ;;  %v963_v53 = vrot.slane %v932_v46, 7  ;;  %v385_v56 = vmul.f32 %v1373_v7, %v1660_v51  ;;  %v493_v57 = vmul.f32 %v1367_v5, %v1530_v45 }
  0x3e   : > { %v415_v55 = vadd.f32 %v384_v42, %v347_v16  ;;  %v979_v58 = vrot.slane %v933_v49, 7  ;;  %v494_v60 = vmul.f32 %v1367_v5, %v1560_v22  ;;  %v530_v61 = vmul.f32 %v1378_v8, %v1590_v47 }
  0x3f   : > { %v531_v63 = vmul.f32 %v1378_v8, %v1610_v62  ;;  %v416_v2 = vadd.f32 %v385_v56, %v348_v52  ;;  %v599_v3 = vmul.f32 %v1385_v10, %v1660_v51  ;;  %v600_v6 = vmul.f32 %v1385_v10, %v1667_v59 }
  0x40   : > { %v453_v1 = vadd.f32 %v1456_v38, %v415_v55  ;;  %v1012_v9 = vsel %vm992_vm2, %v979_v58, %v963_v53  ;;  %v996_v19 = vsel %vm992_vm2, %v963_v53, %v979_v58  ;;  %v562_v23 = vadd.f32 %v530_v61, %v493_v57 }
  0x41   : > { %v563_v24 = vadd.f32 %v531_v63, %v494_v60  ;;  %v1031_v25 = vsel %vm958_vm1, %v1012_v9, 0.0  ;;  %v454_v27 = vadd.f32 %v1456_v38, %v416_v2  ;;  %v797_v28 = vmul.f32 %v1390_v11, %v1530_v45  ;;  %v1729_v60 = vld [vmem:[%s1397_s6 + $0x68] sm:$0xff] }
  0x42   : > { %v760_v26 = vadd.f32 %v728_v50, %v453_v1  ;;  %v1063_v29 = vadd.f32 %v1031_v25, %v759_v48  ;;  %v630_v30 = vadd.f32 %v599_v3, %v562_v23  ;;  %v798_v32 = vmul.f32 %v1390_v11, %v1560_v22  ;;  %v1718_v48 = vld [vmem:[%s1397_s6 + $0x60] sm:$0xff] }
  0x43   : > { %v631_v31 = vadd.f32 %v600_v6, %v563_v24  ;;  %v834_v34 = vmul.f32 %v1404_v13, %v1590_v47  ;;  %v835_v35 = vmul.f32 %v1404_v13, %v1610_v62  ;;  %v903_v15 = vmul.f32 %v1409_v14, %v1660_v51 }
  0x44   : > { %v1064_v33 = vadd.f32 %v996_v19, %v760_v26  ;;  %1096 = vst.msk [vmem:[%s1485_s19 + $0x30] sm:$0xff] %vm1089_vm3, %v1063_v29  ;;  %v660_v54 = vrot.slane %v630_v30, 1  ;;  %v904_v17 = vmul.f32 %v1409_v14, %v1667_v59  ;;  %v279_v36 = vmul.f32 %v1355_v0, %v1560_v22 }
  0x45   : > { %v676_v45 = vrot.slane %v631_v31, 1  ;;  %v866_v37 = vadd.f32 %v834_v34, %v797_v28  ;;  %v867_v39 = vadd.f32 %v835_v35, %v798_v32  ;;  %v317_v40 = vmul.f32 %v1420_v18, %v1610_v62 }
  0x46   : > { %1097 = vst.msk [vmem:[%s1485_s19 + $0x38] sm:$0xff] %vm1089_vm3, %v1064_v33  ;;  %v386_v41 = vmul.f32 %v1373_v7, %v1667_v59  ;;  %v280_v22 = vmul.f32 %v1355_v0, %v1590_v47  ;;  %v318_v12 = vmul.f32 %v1420_v18, %v1660_v51  ;;  %v387_v52 = vmul.f32 %v1373_v7, %v1718_v48 }
  0x47   : > { %v693_v42 = vsel %vm688_vm0, %v660_v54, %v676_v45  ;;  %v709_v43 = vsel %vm688_vm0, %v676_v45, %v660_v54  ;;  %v934_v46 = vadd.f32 %v903_v15, %v866_v37  ;;  %v935_v16 = vadd.f32 %v904_v17, %v867_v39 }
  0x48   : > { %v761_v44 = vadd.f32 %v693_v42, %v454_v27  ;;  %v349_v21 = vadd.f32 %v317_v40, %v279_v36  ;;  %v730_v49 = vsel %vm655_vm4, %v709_v43, 0.0  ;;  %v350_v50 = vadd.f32 %v318_v12, %v280_v22 }
  0x49   : > { %v495_v53 = vmul.f32 %v1367_v5, %v1590_v47  ;;  %v964_v55 = vrot.slane %v934_v46, 7  ;;  %v980_v56 = vrot.slane %v935_v16, 7  ;;  %v496_v58 = vmul.f32 %v1367_v5, %v1610_v62 }
  0x4a   : > { %v417_v57 = vadd.f32 %v386_v41, %v349_v21  ;;  %v418_v61 = vadd.f32 %v387_v52, %v350_v50  ;;  %v532_v63 = vmul.f32 %v1378_v8, %v1660_v51  ;;  %v533_v1 = vmul.f32 %v1378_v8, %v1667_v59  ;;  %v1780_v21 = vld [vmem:[%s1397_s6 + $0x70] sm:$0xff] }
  0x4b   : > { %v601_v2 = vmul.f32 %v1385_v10, %v1718_v48  ;;  %v1013_v3 = vsel %vm992_vm2, %v980_v56, %v964_v55  ;;  %v997_v9 = vsel %vm992_vm2, %v964_v55, %v980_v56  ;;  %v602_v19 = vmul.f32 %v1385_v10, %v1729_v60 }
  0x4c   : > { %v455_v6 = vadd.f32 %v1456_v38, %v417_v57  ;;  %v1033_v23 = vsel %vm958_vm1, %v1013_v3, 0.0  ;;  %v456_v24 = vadd.f32 %v1456_v38, %v418_v61  ;;  %v564_v25 = vadd.f32 %v532_v63, %v495_v53 }
  0x4d   : > { %v565_v26 = vadd.f32 %v533_v1, %v496_v58  ;;  %v1065_v27 = vadd.f32 %v1033_v23, %v761_v44  ;;  %v799_v29 = vmul.f32 %v1390_v11, %v1590_v47  ;;  %v800_v30 = vmul.f32 %v1390_v11, %v1610_v62 }
  0x4e   : > { %v762_v28 = vadd.f32 %v730_v49, %v455_v6  ;;  %v632_v31 = vadd.f32 %v601_v2, %v564_v25  ;;  %v836_v33 = vmul.f32 %v1404_v13, %v1660_v51  ;;  %v837_v34 = vmul.f32 %v1404_v13, %v1667_v59 }
  0x4f   : > { %v633_v32 = vadd.f32 %v602_v19, %v565_v26  ;;  %1098 = vst.msk [vmem:[%s1485_s19 + $0x40] sm:$0xff] %vm1089_vm3, %v1065_v27  ;;  %v905_v15 = vmul.f32 %v1409_v14, %v1718_v48  ;;  %v906_v47 = vmul.f32 %v1409_v14, %v1729_v60  ;;  %v281_v54 = vmul.f32 %v1355_v0, %v1610_v62  ;;  %v1802_v19 = vld [vmem:[%s1397_s6 + $0x78] sm:$0xff] }
  0x50   : > { %v1066_v35 = vadd.f32 %v997_v9, %v762_v28  ;;  %v661_v45 = vrot.slane %v632_v31, 1  ;;  %v868_v36 = vadd.f32 %v836_v33, %v799_v29  ;;  %v869_v37 = vadd.f32 %v837_v34, %v800_v30 }
  0x51   : > { %v677_v17 = vrot.slane %v633_v32, 1  ;;  %v319_v39 = vmul.f32 %v1420_v18, %v1667_v59  ;;  %v388_v40 = vmul.f32 %v1373_v7, %v1729_v60  ;;  %v282_v41 = vmul.f32 %v1355_v0, %v1660_v51 }
  0x52   : > { %1099 = vst.msk [vmem:[%s1485_s19 + $0x48] sm:$0xff] %vm1089_vm3, %v1066_v35  ;;  %v320_v42 = vmul.f32 %v1420_v18, %v1718_v48  ;;  %v936_v43 = vadd.f32 %v905_v15, %v868_v36  ;;  %v937_v22 = vadd.f32 %v906_v47, %v869_v37  ;;  %v389_v53 = vmul.f32 %v1373_v7, %v1780_v21 }
  0x53   : > { %v694_v62 = vsel %vm688_vm0, %v661_v45, %v677_v17  ;;  %v710_v12 = vsel %vm688_vm0, %v677_v17, %v661_v45  ;;  %v351_v46 = vadd.f32 %v319_v39, %v281_v54  ;;  %v497_v55 = vmul.f32 %v1367_v5, %v1660_v51 }
  0x54   : > { %v763_v44 = vadd.f32 %v694_v62, %v456_v24  ;;  %v732_v16 = vsel %vm655_vm4, %v710_v12, 0.0  ;;  %v352_v49 = vadd.f32 %v320_v42, %v282_v41  ;;  %v965_v50 = vrot.slane %v936_v43, 7 }
  0x55   : > { %v981_v52 = vrot.slane %v937_v22, 7  ;;  %v419_v56 = vadd.f32 %v388_v40, %v351_v46  ;;  %v498_v57 = vmul.f32 %v1367_v5, %v1667_v59  ;;  %v534_v58 = vmul.f32 %v1378_v8, %v1718_v48  ;;  %v1828_v40 = vld [vmem:[%s1397_s6 + $0x80] sm:$0xff] }
  0x56   : > { %v535_v61 = vmul.f32 %v1378_v8, %v1729_v60  ;;  %v420_v2 = vadd.f32 %v389_v53, %v352_v49  ;;  %v603_v3 = vmul.f32 %v1385_v10, %v1780_v21  ;;  %v604_v27 = vmul.f32 %v1385_v10, %v1802_v19 }
  0x57   : > { %v1014_v63 = vsel %vm992_vm2, %v981_v52, %v965_v50  ;;  %v998_v1 = vsel %vm992_vm2, %v965_v50, %v981_v52  ;;  %v457_v9 = vadd.f32 %v1456_v38, %v419_v56  ;;  %v566_v23 = vadd.f32 %v534_v58, %v497_v55 }
  0x58   : > { %v1035_v6 = vsel %vm958_vm1, %v1014_v63, 0.0  ;;  %v567_v24 = vadd.f32 %v535_v61, %v498_v57  ;;  %v458_v26 = vadd.f32 %v1456_v38, %v420_v2  ;;  %v801_v28 = vmul.f32 %v1390_v11, %v1660_v51  ;;  %v1849_v57 = vld [vmem:[%s1397_s6 + $0x88] sm:$0xff] }
  0x59   : > { %v1067_v25 = vadd.f32 %v1035_v6, %v763_v44  ;;  %v764_v29 = vadd.f32 %v732_v16, %v457_v9  ;;  %v634_v30 = vadd.f32 %v603_v3, %v566_v23  ;;  %v802_v31 = vmul.f32 %v1390_v11, %v1667_v59 }
  0x5a   : > { %v838_v32 = vmul.f32 %v1404_v13, %v1718_v48  ;;  %v635_v33 = vadd.f32 %v604_v27, %v567_v24  ;;  %v839_v34 = vmul.f32 %v1404_v13, %v1729_v60  ;;  %v907_v35 = vmul.f32 %v1409_v14, %v1780_v21 }
  0x5b   : > { %1100 = vst.msk [vmem:[%s1485_s19 + $0x50] sm:$0xff] %vm1089_vm3, %v1067_v25  ;;  %v908_v51 = vmul.f32 %v1409_v14, %v1802_v19  ;;  %v1068_v15 = vadd.f32 %v998_v1, %v764_v29  ;;  %v662_v47 = vrot.slane %v634_v30, 1  ;;  %v283_v45 = vmul.f32 %v1355_v0, %v1667_v59 }
  0x5c   : > { %v870_v54 = vadd.f32 %v838_v32, %v801_v28  ;;  %v678_v17 = vrot.slane %v635_v33, 1  ;;  %v871_v36 = vadd.f32 %v839_v34, %v802_v31  ;;  %v321_v37 = vmul.f32 %v1420_v18, %v1729_v60 }
  0x5d   : > { %v390_v39 = vmul.f32 %v1373_v7, %v1802_v19  ;;  %1101 = vst.msk [vmem:[%s1485_s19 + $0x58] sm:$0xff] %vm1089_vm3, %v1068_v15  ;;  %v284_v42 = vmul.f32 %v1355_v0, %v1718_v48  ;;  %v322_v59 = vmul.f32 %v1420_v18, %v1780_v21  ;;  %v391_v62 = vmul.f32 %v1373_v7, %v1828_v40 }
  0x5e   : > { %v938_v41 = vadd.f32 %v907_v35, %v870_v54  ;;  %v695_v43 = vsel %vm688_vm0, %v662_v47, %v678_v17  ;;  %v939_v22 = vadd.f32 %v908_v51, %v871_v36  ;;  %v353_v12 = vadd.f32 %v321_v37, %v283_v45 }
  0x5f   : > { %v711_v44 = vsel %vm688_vm0, %v678_v17, %v662_v47  ;;  %v765_v46 = vadd.f32 %v695_v43, %v458_v26  ;;  %v354_v50 = vadd.f32 %v322_v59, %v284_v42  ;;  %v499_v55 = vmul.f32 %v1367_v5, %v1718_v48 }
  0x60   : > { %v966_v16 = vrot.slane %v938_v41, 7  ;;  %v734_v49 = vsel %vm655_vm4, %v711_v44, 0.0  ;;  %v982_v52 = vrot.slane %v939_v22, 7  ;;  %v421_v53 = vadd.f32 %v390_v39, %v353_v12  ;;  %v1900_v44 = vld [vmem:[%s1397_s6 + $0x90] sm:$0xff] }
  0x61   : > { %v500_v56 = vmul.f32 %v1367_v5, %v1729_v60  ;;  %v422_v58 = vadd.f32 %v391_v62, %v354_v50  ;;  %v536_v61 = vmul.f32 %v1378_v8, %v1780_v21  ;;  %v537_v63 = vmul.f32 %v1378_v8, %v1802_v19 }
  0x62   : > { %v605_v1 = vmul.f32 %v1385_v10, %v1828_v40  ;;  %v1015_v2 = vsel %vm992_vm2, %v982_v52, %v966_v16  ;;  %v459_v3 = vadd.f32 %v1456_v38, %v421_v53  ;;  %v999_v6 = vsel %vm992_vm2, %v966_v16, %v982_v52 }
  0x63   : > { %v606_v9 = vmul.f32 %v1385_v10, %v1849_v57  ;;  %v1037_v23 = vsel %vm958_vm1, %v1015_v2, 0.0  ;;  %v460_v24 = vadd.f32 %v1456_v38, %v422_v58  ;;  %v568_v25 = vadd.f32 %v536_v61, %v499_v55 }
  0x64   : > { %v569_v26 = vadd.f32 %v537_v63, %v500_v56  ;;  %v1069_v27 = vadd.f32 %v1037_v23, %v765_v46  ;;  %v766_v28 = vadd.f32 %v734_v49, %v459_v3  ;;  %v803_v29 = vmul.f32 %v1390_v11, %v1718_v48 }
  0x65   : > { %v804_v30 = vmul.f32 %v1390_v11, %v1729_v60  ;;  %v636_v31 = vadd.f32 %v605_v1, %v568_v25  ;;  %v840_v33 = vmul.f32 %v1404_v13, %v1780_v21  ;;  %v841_v34 = vmul.f32 %v1404_v13, %v1802_v19 }
  0x66   : > { %v637_v32 = vadd.f32 %v606_v9, %v569_v26  ;;  %1102 = vst.msk [vmem:[%s1485_s19 + $0x60] sm:$0xff] %vm1089_vm3, %v1069_v27  ;;  %v1070_v35 = vadd.f32 %v999_v6, %v766_v28  ;;  %v909_v51 = vmul.f32 %v1409_v14, %v1828_v40  ;;  %v910_v48 = vmul.f32 %v1409_v14, %v1849_v57  ;;  %v1922_v9 = vld [vmem:[%s1397_s6 + $0x98] sm:$0xff] }
  0x67   : > { %v285_v15 = vmul.f32 %v1355_v0, %v1729_v60  ;;  %v663_v47 = vrot.slane %v636_v31, 1  ;;  %v872_v45 = vadd.f32 %v840_v33, %v803_v29  ;;  %v873_v17 = vadd.f32 %v841_v34, %v804_v30 }
  0x68   : > { %v679_v54 = vrot.slane %v637_v32, 1  ;;  %1103 = vst.msk [vmem:[%s1485_s19 + $0x68] sm:$0xff] %vm1089_vm3, %v1070_v35  ;;  %v323_v36 = vmul.f32 %v1420_v18, %v1802_v19  ;;  %v392_v37 = vmul.f32 %v1373_v7, %v1849_v57  ;;  %v286_v39 = vmul.f32 %v1355_v0, %v1780_v21 }
  0x69   : > { %v324_v41 = vmul.f32 %v1420_v18, %v1828_v40  ;;  %v940_v42 = vadd.f32 %v909_v51, %v872_v45  ;;  %v941_v59 = vadd.f32 %v910_v48, %v873_v17  ;;  %v393_v50 = vmul.f32 %v1373_v7, %v1900_v44 }
  0x6a   : > { %v696_v60 = vsel %vm688_vm0, %v663_v47, %v679_v54  ;;  %v712_v62 = vsel %vm688_vm0, %v679_v54, %v663_v47  ;;  %v355_v22 = vadd.f32 %v323_v36, %v285_v15  ;;  %v501_v52 = vmul.f32 %v1367_v5, %v1780_v21 }
  0x6b   : > { %v767_v43 = vadd.f32 %v696_v60, %v460_v24  ;;  %v736_v12 = vsel %vm655_vm4, %v712_v62, 0.0  ;;  %v356_v46 = vadd.f32 %v324_v41, %v286_v39  ;;  %v967_v16 = vrot.slane %v940_v42, 7 }
  0x6c   : > { %v983_v49 = vrot.slane %v941_v59, 7  ;;  %v423_v53 = vadd.f32 %v392_v37, %v355_v22  ;;  %v502_v55 = vmul.f32 %v1367_v5, %v1802_v19  ;;  %v538_v56 = vmul.f32 %v1378_v8, %v1828_v40  ;;  %v1948_v37 = vld [vmem:[%s1397_s6 + $0xa0] sm:$0xff] }
  0x6d   : > { %v539_v58 = vmul.f32 %v1378_v8, %v1849_v57  ;;  %v424_v1 = vadd.f32 %v393_v50, %v356_v46  ;;  %v607_v2 = vmul.f32 %v1385_v10, %v1900_v44  ;;  %v608_v27 = vmul.f32 %v1385_v10, %v1922_v9 }
  0x6e   : > { %v1016_v61 = vsel %vm992_vm2, %v983_v49, %v967_v16  ;;  %v1000_v63 = vsel %vm992_vm2, %v967_v16, %v983_v49  ;;  %v461_v6 = vadd.f32 %v1456_v38, %v423_v53  ;;  %v570_v23 = vadd.f32 %v538_v56, %v501_v52 }
  0x6f   : > { %v1039_v3 = vsel %vm958_vm1, %v1016_v61, 0.0  ;;  %v571_v24 = vadd.f32 %v539_v58, %v502_v55  ;;  %v462_v26 = vadd.f32 %v1456_v38, %v424_v1  ;;  %v805_v28 = vmul.f32 %v1390_v11, %v1780_v21  ;;  %v1969_v55 = vld [vmem:[%s1397_s6 + $0xa8] sm:$0xff] }
  0x70   : > { %v1071_v25 = vadd.f32 %v1039_v3, %v767_v43  ;;  %v768_v29 = vadd.f32 %v736_v12, %v461_v6  ;;  %v638_v30 = vadd.f32 %v607_v2, %v570_v23  ;;  %v806_v31 = vmul.f32 %v1390_v11, %v1802_v19 }
  0x71   : > { %v842_v32 = vmul.f32 %v1404_v13, %v1828_v40  ;;  %v639_v33 = vadd.f32 %v608_v27, %v571_v24  ;;  %v843_v34 = vmul.f32 %v1404_v13, %v1849_v57  ;;  %v911_v35 = vmul.f32 %v1409_v14, %v1900_v44 }
  0x72   : > { %1104 = vst.msk [vmem:[%s1485_s19 + $0x70] sm:$0xff] %vm1089_vm3, %v1071_v25  ;;  %v912_v21 = vmul.f32 %v1409_v14, %v1922_v9  ;;  %v1072_v51 = vadd.f32 %v1000_v63, %v768_v29  ;;  %v664_v48 = vrot.slane %v638_v30, 1  ;;  %v287_v47 = vmul.f32 %v1355_v0, %v1802_v19 }
  0x73   : > { %v874_v15 = vadd.f32 %v842_v32, %v805_v28  ;;  %v680_v54 = vrot.slane %v639_v33, 1  ;;  %v875_v45 = vadd.f32 %v843_v34, %v806_v31  ;;  %v325_v17 = vmul.f32 %v1420_v18, %v1849_v57 }
  0x74   : > { %v394_v36 = vmul.f32 %v1373_v7, %v1922_v9  ;;  %1105 = vst.msk [vmem:[%s1485_s19 + $0x78] sm:$0xff] %vm1089_vm3, %v1072_v51  ;;  %v288_v41 = vmul.f32 %v1355_v0, %v1828_v40  ;;  %v326_v19 = vmul.f32 %v1420_v18, %v1900_v44  ;;  %v395_v60 = vmul.f32 %v1373_v7, %v1948_v37 }
  0x75   : > { %v942_v39 = vadd.f32 %v911_v35, %v874_v15  ;;  %v697_v42 = vsel %vm688_vm0, %v664_v48, %v680_v54  ;;  %v943_v59 = vadd.f32 %v912_v21, %v875_v45  ;;  %v357_v62 = vadd.f32 %v325_v17, %v287_v47 }
  0x76   : > { %v713_v43 = vsel %vm688_vm0, %v680_v54, %v664_v48  ;;  %v769_v22 = vadd.f32 %v697_v42, %v462_v26  ;;  %v358_v16 = vadd.f32 %v326_v19, %v288_v41  ;;  %v503_v52 = vmul.f32 %v1367_v5, %v1828_v40  ;;  %v2020_v41 = vld [vmem:[%s1397_s6 + $0xb0] sm:$0xff] }
  0x77   : > { %v968_v12 = vrot.slane %v942_v39, 7  ;;  %v738_v46 = vsel %vm655_vm4, %v713_v43, 0.0  ;;  %v984_v49 = vrot.slane %v943_v59, 7  ;;  %v425_v50 = vadd.f32 %v394_v36, %v357_v62  ;;  %v2027_v59 = vld [vmem:[%s2426_s1 + $0x2] ss:$0 sm:$0xff] }
  0x78   : > { %v504_v53 = vmul.f32 %v1367_v5, %v1849_v57  ;;  %v426_v56 = vadd.f32 %v395_v60, %v358_v16  ;;  %v540_v58 = vmul.f32 %v1378_v8, %v1900_v44  ;;  %v541_v61 = vmul.f32 %v1378_v8, %v1922_v9 }
  0x79   : > { %v609_v63 = vmul.f32 %v1385_v10, %v1948_v37  ;;  %v1017_v1 = vsel %vm992_vm2, %v984_v49, %v968_v12  ;;  %v463_v2 = vadd.f32 %v1456_v38, %v425_v50  ;;  %v1001_v5 = vsel %vm992_vm2, %v968_v12, %v984_v49  ;;  %v2036_v12 = vld [vmem:[%s2426_s1 + $0x5] ss:$0 sm:$0xff] }
  0x7a   : > { %v610_v3 = vmul.f32 %v1385_v10, %v1969_v55  ;;  %v1041_v6 = vsel %vm958_vm1, %v1017_v1, 0.0  ;;  %v464_v8 = vadd.f32 %v1456_v38, %v426_v56  ;;  %v572_v23 = vadd.f32 %v540_v58, %v503_v52  ;;  %v2049_v52 = vld [vmem:[%s2426_s1 + $0x8] ss:$0 sm:$0xff] }
  0x7b   : > { %v573_v24 = vadd.f32 %v541_v61, %v504_v53  ;;  %v1073_v25 = vadd.f32 %v1041_v6, %v769_v22  ;;  %v770_v26 = vadd.f32 %v738_v46, %v463_v2  ;;  %v807_v27 = vmul.f32 %v1390_v11, %v1828_v40  ;;  %v2057_v61 = vld [vmem:[%s1397_s6 + $0xb8] sm:$0xff]  ;;  %v2065_v6 = vld [vmem:[%s2426_s1] ss:$0 sm:$0xff] }
  0x7c   : > { %v808_v28 = vmul.f32 %v1390_v11, %v1849_v57  ;;  %v640_v29 = vadd.f32 %v609_v63, %v572_v23  ;;  %v844_v10 = vmul.f32 %v1404_v13, %v1900_v44  ;;  %v845_v31 = vmul.f32 %v1404_v13, %v1922_v9 }
  0x7d   : > { %v641_v30 = vadd.f32 %v610_v3, %v573_v24  ;;  %1106 = vst.msk [vmem:[%s1485_s19 + $0x80] sm:$0xff] %vm1089_vm3, %v1073_v25  ;;  %v1074_v32 = vadd.f32 %v1001_v5, %v770_v26  ;;  %v913_v33 = vmul.f32 %v1409_v14, %v1948_v37  ;;  %v914_v40 = vmul.f32 %v1409_v14, %v1969_v55 }
  0x7e   : > { %v289_v11 = vmul.f32 %v1355_v0, %v1849_v57  ;;  %v665_v34 = vrot.slane %v640_v29, 1  ;;  %v876_v21 = vadd.f32 %v844_v10, %v807_v27  ;;  %v877_v51 = vadd.f32 %v845_v31, %v808_v28  ;;  %v2085_v28 = vld [vmem:[%s2426_s1 + $0x6] ss:$0 sm:$0xff] }
  0x7f   : > { %v681_v35 = vrot.slane %v641_v30, 1  ;;  %1107 = vst.msk [vmem:[%s1485_s19 + $0x88] sm:$0xff] %vm1089_vm3, %v1074_v32  ;;  %v327_v13 = vmul.f32 %v1420_v18, %v1922_v9  ;;  %v396_v48 = vmul.f32 %v1373_v7, %v1969_v55  ;;  %v290_v15 = vmul.f32 %v1355_v0, %v1900_v44 }
  0x80   : > { %v328_v14 = vmul.f32 %v1420_v18, %v1948_v37  ;;  %v944_v47 = vadd.f32 %v913_v33, %v876_v21  ;;  %v945_v54 = vadd.f32 %v914_v40, %v877_v51  ;;  %v397_v42 = vmul.f32 %v1373_v7, %v2020_v41  ;;  %v2094_v33 = vld [vmem:[%s2426_s1 + $0x1] ss:$0 sm:$0xff]  ;;  %v2103_v21 = vld [vmem:[%s2426_s1 + $0x7] ss:$0 sm:$0xff] }
  0x81   : > { %v698_v57 = vsel %vm688_vm0, %v665_v34, %v681_v35  ;;  %v714_v45 = vsel %vm688_vm0, %v681_v35, %v665_v34  ;;  %v359_v36 = vadd.f32 %v327_v13, %v289_v11  ;;  %v505_v62 = vmul.f32 %v2027_v59, %v1900_v44  ;;  %v2108_v13 = vld [vmem:[%s1397_s6 + $0xc0] sm:$0xff] }
  0x82   : > { %v771_v17 = vadd.f32 %v698_v57, %v464_v8  ;;  %v740_v39 = vsel %vm655_vm4, %v714_v45, 0.0  ;;  %v360_v19 = vadd.f32 %v328_v14, %v290_v15  ;;  %v969_v0 = vrot.slane %v944_v47, 7 }
  0x83   : > { %v985_v60 = vrot.slane %v945_v54, 7  ;;  %v427_v43 = vadd.f32 %v396_v48, %v359_v36  ;;  %v506_v22 = vmul.f32 %v2027_v59, %v1922_v9  ;;  %v542_v7 = vmul.f32 %v2036_v12, %v1948_v37 }
  0x84   : > { %v543_v46 = vmul.f32 %v2036_v12, %v1969_v55  ;;  %v428_v50 = vadd.f32 %v397_v42, %v360_v19  ;;  %v611_v53 = vmul.f32 %v2049_v52, %v2020_v41  ;;  %v612_v3 = vmul.f32 %v2049_v52, %v2057_v61 }
  0x85   : > { %v1018_v16 = vsel %vm992_vm2, %v985_v60, %v969_v0  ;;  %v1002_v49 = vsel %vm992_vm2, %v969_v0, %v985_v60  ;;  %v465_v58 = vadd.f32 %v1456_v38, %v427_v43  ;;  %v574_v63 = vadd.f32 %v542_v7, %v505_v62  ;;  %v2129_v43 = vld [vmem:[%s1397_s6 + $0xc8] sm:$0xff] }
  0x86   : > { %v1043_v56 = vsel %vm958_vm1, %v1018_v16, 0.0  ;;  %v575_v1 = vadd.f32 %v543_v46, %v506_v22  ;;  %v466_v5 = vadd.f32 %v1456_v38, %v428_v50  ;;  %v809_v8 = vmul.f32 %v2065_v6, %v1900_v44  ;;  %v2074_v38 = vld [vmem:[%s2426_s1 + $0x3] ss:$0 sm:$0xff]  ;;  %v2142_v50 = vld [vmem:[%s2427_s2] ss:$0 sm:$0xff] }
  0x87   : > { %v1075_v2 = vadd.f32 %v1043_v56, %v771_v17  ;;  %v772_v23 = vadd.f32 %v740_v39, %v465_v58  ;;  %v642_v24 = vadd.f32 %v611_v53, %v574_v63  ;;  %v810_v25 = vmul.f32 %v2065_v6, %v1922_v9 }
  0x88   : > { %v846_v26 = vmul.f32 %v2074_v38, %v1948_v37  ;;  %v643_v27 = vadd.f32 %v612_v3, %v575_v1  ;;  %v847_v44 = vmul.f32 %v2074_v38, %v1969_v55  ;;  %v915_v29 = vmul.f32 %v2085_v28, %v2020_v41 }
  0x89   : > { %1108 = vst.msk [vmem:[%s1485_s19 + $0x90] sm:$0xff] %vm1089_vm3, %v1075_v2  ;;  %v916_v30 = vmul.f32 %v2085_v28, %v2057_v61  ;;  %v1076_v10 = vadd.f32 %v1002_v49, %v772_v23  ;;  %v666_v31 = vrot.slane %v642_v24, 1  ;;  %v291_v40 = vmul.f32 %v2094_v33, %v1922_v9 }
  0x8a   : > { %v878_v32 = vadd.f32 %v846_v26, %v809_v8  ;;  %v682_v11 = vrot.slane %v643_v27, 1  ;;  %v879_v34 = vadd.f32 %v847_v44, %v810_v25  ;;  %v329_v35 = vmul.f32 %v1420_v18, %v1969_v55 }
  0x8b   : > { %v398_v51 = vmul.f32 %v2103_v21, %v2057_v61  ;;  %1109 = vst.msk [vmem:[%s1485_s19 + $0x98] sm:$0xff] %vm1089_vm3, %v1076_v10  ;;  %v292_v9 = vmul.f32 %v2094_v33, %v1948_v37  ;;  %v330_v15 = vmul.f32 %v1420_v18, %v2020_v41  ;;  %v399_v14 = vmul.f32 %v2103_v21, %v2108_v13 }
  0x8c   : > { %v946_v48 = vadd.f32 %v915_v29, %v878_v32  ;;  %v699_v57 = vsel %vm688_vm0, %v666_v31, %v682_v11  ;;  %v947_v47 = vadd.f32 %v916_v30, %v879_v34  ;;  %v361_v54 = vadd.f32 %v329_v35, %v291_v40 }
  0x8d   : > { %v715_v45 = vsel %vm688_vm0, %v682_v11, %v666_v31  ;;  %v773_v17 = vadd.f32 %v699_v57, %v466_v5  ;;  %v362_v19 = vadd.f32 %v330_v15, %v292_v9  ;;  %v507_v42 = vmul.f32 %v2027_v59, %v1948_v37 }
  0x8e   : > { %v970_v36 = vrot.slane %v946_v48, 7  ;;  %v742_v39 = vsel %vm655_vm4, %v715_v45, 0.0  ;;  %v986_v0 = vrot.slane %v947_v47, 7  ;;  %v429_v60 = vadd.f32 %v398_v51, %v361_v54  ;;  %v2185_v45 = vld [vmem:[%s1397_s6 + $0xd0] sm:$0xff] }
  0x8f   : > { %v508_v62 = vmul.f32 %v2027_v59, %v1969_v55  ;;  %v430_v22 = vadd.f32 %v399_v14, %v362_v19  ;;  %v544_v7 = vmul.f32 %v2036_v12, %v2020_v41  ;;  %v545_v46 = vmul.f32 %v2036_v12, %v2057_v61 }
  0x90   : > { %v613_v16 = vmul.f32 %v2049_v52, %v2108_v13  ;;  %v1019_v49 = vsel %vm992_vm2, %v986_v0, %v970_v36  ;;  %v467_v53 = vadd.f32 %v2142_v50, %v429_v60  ;;  %v1003_v56 = vsel %vm992_vm2, %v970_v36, %v986_v0 }
  0x91   : > { %v614_v58 = vmul.f32 %v2049_v52, %v2129_v43  ;;  %v1045_v63 = vsel %vm958_vm1, %v1019_v49, 0.0  ;;  %v468_v1 = vadd.f32 %v2142_v50, %v430_v22  ;;  %v576_v2 = vadd.f32 %v544_v7, %v507_v42 }
  0x92   : > { %v577_v5 = vadd.f32 %v545_v46, %v508_v62  ;;  %v1077_v3 = vadd.f32 %v1045_v63, %v773_v17  ;;  %v774_v8 = vadd.f32 %v742_v39, %v467_v53  ;;  %v811_v23 = vmul.f32 %v2065_v6, %v1948_v37 }
  0x93   : > { %v812_v24 = vmul.f32 %v2065_v6, %v1969_v55  ;;  %v644_v25 = vadd.f32 %v613_v16, %v576_v2  ;;  %v848_v27 = vmul.f32 %v2074_v38, %v2020_v41  ;;  %v849_v44 = vmul.f32 %v2074_v38, %v2057_v61 }
  0x94   : > { %v645_v26 = vadd.f32 %v614_v58, %v577_v5  ;;  %1110 = vst.msk [vmem:[%s1485_s19 + $0xa0] sm:$0xff] %vm1089_vm3, %v1077_v3  ;;  %v1078_v29 = vadd.f32 %v1003_v56, %v774_v8  ;;  %v917_v30 = vmul.f32 %v2085_v28, %v2108_v13  ;;  %v918_v37 = vmul.f32 %v2085_v28, %v2129_v43  ;;  %v2207_v58 = vld [vmem:[%s1397_s6 + $0xd8] sm:$0xff] }
  0x95   : > { %v293_v10 = vmul.f32 %v2094_v33, %v1969_v55  ;;  %v667_v31 = vrot.slane %v644_v25, 1  ;;  %v880_v40 = vadd.f32 %v848_v27, %v811_v23  ;;  %v881_v11 = vadd.f32 %v849_v44, %v812_v24 }
  0x96   : > { %v683_v32 = vrot.slane %v645_v26, 1  ;;  %1111 = vst.msk [vmem:[%s1485_s19 + $0xa8] sm:$0xff] %vm1089_vm3, %v1078_v29  ;;  %v331_v34 = vmul.f32 %v1420_v18, %v2057_v61  ;;  %v400_v35 = vmul.f32 %v2103_v21, %v2129_v43  ;;  %v294_v51 = vmul.f32 %v2094_v33, %v2020_v41 }
  0x97   : > { %v332_v48 = vmul.f32 %v1420_v18, %v2108_v13  ;;  %v948_v9 = vadd.f32 %v917_v30, %v880_v40  ;;  %v949_v15 = vadd.f32 %v918_v37, %v881_v11  ;;  %v401_v19 = vmul.f32 %v2103_v21, %v2185_v45 }
  0x98   : > { %v700_v55 = vsel %vm688_vm0, %v667_v31, %v683_v32  ;;  %v716_v14 = vsel %vm688_vm0, %v683_v32, %v667_v31  ;;  %v363_v47 = vadd.f32 %v331_v34, %v293_v10  ;;  %v509_v0 = vmul.f32 %v2027_v59, %v2020_v41 }
  0x99   : > { %v775_v57 = vadd.f32 %v700_v55, %v468_v1  ;;  %v744_v54 = vsel %vm655_vm4, %v716_v14, 0.0  ;;  %v364_v17 = vadd.f32 %v332_v48, %v294_v51  ;;  %v971_v36 = vrot.slane %v948_v9, 7 }
  0x9a   : > { %v987_v39 = vrot.slane %v949_v15, 7  ;;  %v431_v60 = vadd.f32 %v400_v35, %v363_v47  ;;  %v510_v42 = vmul.f32 %v2027_v59, %v2057_v61  ;;  %v546_v62 = vmul.f32 %v2036_v12, %v2108_v13  ;;  %v2233_v35 = vld [vmem:[%s1397_s6 + $0xe0] sm:$0xff] }
  0x9b   : > { %v547_v22 = vmul.f32 %v2036_v12, %v2129_v43  ;;  %v432_v16 = vadd.f32 %v401_v19, %v364_v17  ;;  %v615_v49 = vmul.f32 %v2049_v52, %v2185_v45  ;;  %v616_v3 = vmul.f32 %v2049_v52, %v2207_v58 }
  0x9c   : > { %v1020_v7 = vsel %vm992_vm2, %v987_v39, %v971_v36  ;;  %v1004_v46 = vsel %vm992_vm2, %v971_v36, %v987_v39  ;;  %v469_v56 = vadd.f32 %v2142_v50, %v431_v60  ;;  %v578_v63 = vadd.f32 %v546_v62, %v509_v0 }
  0x9d   : > { %v1047_v53 = vsel %vm958_vm1, %v1020_v7, 0.0  ;;  %v579_v1 = vadd.f32 %v547_v22, %v510_v42  ;;  %v470_v5 = vadd.f32 %v2142_v50, %v432_v16  ;;  %v813_v8 = vmul.f32 %v2065_v6, %v2020_v41  ;;  %v2254_v42 = vld [vmem:[%s1397_s6 + $0xe8] sm:$0xff] }
  0x9e   : > { %v1079_v2 = vadd.f32 %v1047_v53, %v775_v57  ;;  %v776_v23 = vadd.f32 %v744_v54, %v469_v56  ;;  %v646_v24 = vadd.f32 %v615_v49, %v578_v63  ;;  %v814_v25 = vmul.f32 %v2065_v6, %v2057_v61 }
  0x9f   : > { %v850_v26 = vmul.f32 %v2074_v38, %v2108_v13  ;;  %v647_v27 = vadd.f32 %v616_v3, %v579_v1  ;;  %v851_v44 = vmul.f32 %v2074_v38, %v2129_v43  ;;  %v919_v29 = vmul.f32 %v2085_v28, %v2185_v45 }
  0xa0   : > { %1112 = vst.msk [vmem:[%s1485_s19 + $0xb0] sm:$0xff] %vm1089_vm3, %v1079_v2  ;;  %v920_v41 = vmul.f32 %v2085_v28, %v2207_v58  ;;  %v1080_v30 = vadd.f32 %v1004_v46, %v776_v23  ;;  %v668_v37 = vrot.slane %v646_v24, 1  ;;  %v295_v31 = vmul.f32 %v2094_v33, %v2057_v61 }
  0xa1   : > { %v882_v10 = vadd.f32 %v850_v26, %v813_v8  ;;  %v684_v32 = vrot.slane %v647_v27, 1  ;;  %v883_v40 = vadd.f32 %v851_v44, %v814_v25  ;;  %v333_v11 = vmul.f32 %v1420_v18, %v2129_v43 }
  0xa2   : > { %v402_v34 = vmul.f32 %v2103_v21, %v2207_v58  ;;  %1113 = vst.msk [vmem:[%s1485_s19 + $0xb8] sm:$0xff] %vm1089_vm3, %v1080_v30  ;;  %v296_v48 = vmul.f32 %v2094_v33, %v2108_v13  ;;  %v334_v61 = vmul.f32 %v1420_v18, %v2185_v45  ;;  %v403_v55 = vmul.f32 %v2103_v21, %v2233_v35 }
  0xa3   : > { %v950_v51 = vadd.f32 %v919_v29, %v882_v10  ;;  %v701_v9 = vsel %vm688_vm0, %v668_v37, %v684_v32  ;;  %v951_v15 = vadd.f32 %v920_v41, %v883_v40  ;;  %v365_v14 = vadd.f32 %v333_v11, %v295_v31 }
  0xa4   : > { %v717_v57 = vsel %vm688_vm0, %v684_v32, %v668_v37  ;;  %v777_v47 = vadd.f32 %v701_v9, %v470_v5  ;;  %v366_v36 = vadd.f32 %v334_v61, %v296_v48  ;;  %v511_v0 = vmul.f32 %v2027_v59, %v2108_v13 }
  0xa5   : > { %v972_v54 = vrot.slane %v950_v51, 7  ;;  %v746_v17 = vsel %vm655_vm4, %v717_v57, 0.0  ;;  %v988_v39 = vrot.slane %v951_v15, 7  ;;  %v433_v19 = vadd.f32 %v402_v34, %v365_v14  ;;  %v2305_v57 = vld [vmem:[%s1397_s6 + $0xf0] sm:$0xff] }
  0xa6   : > { %v512_v60 = vmul.f32 %v2027_v59, %v2129_v43  ;;  %v434_v62 = vadd.f32 %v403_v55, %v366_v36  ;;  %v548_v22 = vmul.f32 %v2036_v12, %v2185_v45  ;;  %v549_v7 = vmul.f32 %v2036_v12, %v2207_v58 }
  0xa7   : > { %v617_v46 = vmul.f32 %v2049_v52, %v2233_v35  ;;  %v1021_v16 = vsel %vm992_vm2, %v988_v39, %v972_v54  ;;  %v471_v49 = vadd.f32 %v2142_v50, %v433_v19  ;;  %v1005_v53 = vsel %vm992_vm2, %v972_v54, %v988_v39 }
  0xa8   : > { %v618_v56 = vmul.f32 %v2049_v52, %v2254_v42  ;;  %v1049_v63 = vsel %vm958_vm1, %v1021_v16, 0.0  ;;  %v472_v1 = vadd.f32 %v2142_v50, %v434_v62  ;;  %v580_v2 = vadd.f32 %v548_v22, %v511_v0 }
  0xa9   : > { %v581_v5 = vadd.f32 %v549_v7, %v512_v60  ;;  %v1081_v3 = vadd.f32 %v1049_v63, %v777_v47  ;;  %v778_v8 = vadd.f32 %v746_v17, %v471_v49  ;;  %v815_v23 = vmul.f32 %v2065_v6, %v2108_v13 }
  0xaa   : > { %v816_v24 = vmul.f32 %v2065_v6, %v2129_v43  ;;  %v648_v25 = vadd.f32 %v617_v46, %v580_v2  ;;  %v852_v27 = vmul.f32 %v2074_v38, %v2185_v45  ;;  %v853_v44 = vmul.f32 %v2074_v38, %v2207_v58 }
  0xab   : > { %v649_v26 = vadd.f32 %v618_v56, %v581_v5  ;;  %1114 = vst.msk [vmem:[%s1485_s19 + $0xc0] sm:$0xff] %vm1089_vm3, %v1081_v3  ;;  %v1082_v29 = vadd.f32 %v1005_v53, %v778_v8  ;;  %v921_v41 = vmul.f32 %v2085_v28, %v2233_v35  ;;  %v922_v13 = vmul.f32 %v2085_v28, %v2254_v42  ;;  %v2327_v56 = vld [vmem:[%s1397_s6 + $0xf8] sm:$0xff] }
  0xac   : > { %v297_v30 = vmul.f32 %v2094_v33, %v2129_v43  ;;  %v669_v37 = vrot.slane %v648_v25, 1  ;;  %v884_v31 = vadd.f32 %v852_v27, %v815_v23  ;;  %v885_v32 = vadd.f32 %v853_v44, %v816_v24 }
  0xad   : > { %v685_v10 = vrot.slane %v649_v26, 1  ;;  %1115 = vst.msk [vmem:[%s1485_s19 + $0xc8] sm:$0xff] %vm1089_vm3, %v1082_v29  ;;  %v335_v40 = vmul.f32 %v1420_v18, %v2207_v58  ;;  %v404_v11 = vmul.f32 %v2103_v21, %v2254_v42  ;;  %v298_v34 = vmul.f32 %v2094_v33, %v2185_v45 }
  0xae   : > { %v336_v51 = vmul.f32 %v1420_v18, %v2233_v35  ;;  %v952_v48 = vadd.f32 %v921_v41, %v884_v31  ;;  %v953_v61 = vadd.f32 %v922_v13, %v885_v32  ;;  %v405_v36 = vmul.f32 %v2103_v21, %v2305_v57 }
  0xaf   : > { %v702_v43 = vsel %vm688_vm0, %v669_v37, %v685_v10  ;;  %v718_v55 = vsel %vm688_vm0, %v685_v10, %v669_v37  ;;  %v367_v15 = vadd.f32 %v335_v40, %v297_v30  ;;  %v513_v39 = vmul.f32 %v2027_v59, %v2185_v45 }
  0xb0   : > { %v779_v9 = vadd.f32 %v702_v43, %v472_v1  ;;  %v748_v14 = vsel %vm655_vm4, %v718_v55, 0.0  ;;  %v368_v47 = vadd.f32 %v336_v51, %v298_v34  ;;  %v973_v54 = vrot.slane %v952_v48, 7 }
  0xb1   : > { %v989_v17 = vrot.slane %v953_v61, 7  ;;  %v435_v19 = vadd.f32 %v404_v11, %v367_v15  ;;  %v514_v0 = vmul.f32 %v2027_v59, %v2207_v58  ;;  %v550_v60 = vmul.f32 %v2036_v12, %v2233_v35 }
  0xb2   : > { %v551_v62 = vmul.f32 %v2036_v12, %v2254_v42  ;;  %v436_v46 = vadd.f32 %v405_v36, %v368_v47  ;;  %v619_v16 = vmul.f32 %v2049_v52, %v2305_v57  ;;  %v620_v3 = vmul.f32 %v2049_v52, %v2327_v56 }
  0xb3   : > { %v1022_v22 = vsel %vm992_vm2, %v989_v17, %v973_v54  ;;  %v1006_v7 = vsel %vm992_vm2, %v973_v54, %v989_v17  ;;  %v473_v53 = vadd.f32 %v2142_v50, %v435_v19  ;;  %v582_v63 = vadd.f32 %v550_v60, %v513_v39 }
  0xb4   : > { %v1051_v49 = vsel %vm958_vm1, %v1022_v22, 0.0  ;;  %v583_v1 = vadd.f32 %v551_v62, %v514_v0  ;;  %v474_v5 = vadd.f32 %v2142_v50, %v436_v46  ;;  %v817_v8 = vmul.f32 %v2065_v6, %v2185_v45 }
  0xb5   : > { %v1083_v2 = vadd.f32 %v1051_v49, %v779_v9  ;;  %v780_v23 = vadd.f32 %v748_v14, %v473_v53  ;;  %v650_v24 = vadd.f32 %v619_v16, %v582_v63  ;;  %v818_v25 = vmul.f32 %v2065_v6, %v2207_v58 }
  0xb6   : > { %v854_v26 = vmul.f32 %v2074_v38, %v2233_v35  ;;  %v651_v27 = vadd.f32 %v620_v3, %v583_v1  ;;  %v855_v44 = vmul.f32 %v2074_v38, %v2254_v42  ;;  %v923_v29 = vmul.f32 %v2085_v28, %v2305_v57 }
  0xb7   : > { %1116 = vst.msk [vmem:[%s1485_s19 + $0xd0] sm:$0xff] %vm1089_vm3, %v1083_v2  ;;  %v924_v45 = vmul.f32 %v2085_v28, %v2327_v56  ;;  %v1084_v41 = vadd.f32 %v1006_v7, %v780_v23  ;;  %v670_v13 = vrot.slane %v650_v24, 1  ;;  %v299_v37 = vmul.f32 %v2094_v33, %v2207_v58 }
  0xb8   : > { %v886_v30 = vadd.f32 %v854_v26, %v817_v8  ;;  %v686_v10 = vrot.slane %v651_v27, 1  ;;  %v887_v31 = vadd.f32 %v855_v44, %v818_v25  ;;  %v337_v32 = vmul.f32 %v1420_v18, %v2254_v42 }
  0xb9   : > { %v406_v40 = vmul.f32 %v2103_v21, %v2327_v56  ;;  %1117 = vst.msk [vmem:[%s1485_s19 + $0xd8] sm:$0xff] %vm1089_vm3, %v1084_v41  ;;  %v300_v34 = vmul.f32 %v2094_v33, %v2233_v35  ;;  %v338_v51 = vmul.f32 %v1420_v18, %v2305_v57  ;;  %v407_v43 = vmul.f32 0.0, %v2103_v21 }
  0xba   : > { %v954_v11 = vadd.f32 %v923_v29, %v886_v30  ;;  %v703_v58 = vsel %vm688_vm0, %v670_v13, %v686_v10  ;;  %v955_v48 = vadd.f32 %v924_v45, %v887_v31  ;;  %v369_v61 = vadd.f32 %v337_v32, %v299_v37 }
  0xbb   : > { %v719_v55 = vsel %vm688_vm0, %v686_v10, %v670_v13  ;;  %v781_v9 = vadd.f32 %v703_v58, %v474_v5  ;;  %v370_v14 = vadd.f32 %v338_v51, %v300_v34  ;;  %v515_v17 = vmul.f32 %v2027_v59, %v2233_v35 }
  0xbc   : > { %v974_v15 = vrot.slane %v954_v11, 7  ;;  %v990_v47 = vrot.slane %v955_v48, 7  ;;  %v437_v54 = vadd.f32 %v406_v40, %v369_v61  ;;  %v516_v36 = vmul.f32 %v2027_v59, %v2254_v42 }
  0xbd   : > { %v750_v21 = vsel %vm655_vm4, %v719_v55, 0.0  ;;  %v552_v39 = vmul.f32 %v2036_v12, %v2305_v57  ;;  %v553_v19 = vmul.f32 %v2036_v12, %v2327_v56  ;;  %v621_v0 = vmul.f32 0.0, %v2049_v52 }
  0xbe   : > { %v1023_v60 = vsel %vm992_vm2, %v990_v47, %v974_v15  ;;  %v475_v62 = vadd.f32 %v2142_v50, %v437_v54  ;;  %v438_v22 = vadd.f32 %v407_v43, %v370_v14  ;;  %v819_v59 = vmul.f32 %v2065_v6, %v2233_v35 }
  0xbf   : > { %v1053_v7 = vsel %vm958_vm1, %v1023_v60, 0.0  ;;  %v1007_v46 = vsel %vm992_vm2, %v974_v15, %v990_v47  ;;  %v584_v16 = vadd.f32 %v552_v39, %v515_v17  ;;  %v585_v12 = vadd.f32 %v553_v19, %v516_v36 }
  0xc0   : > { %v1085_v49 = vadd.f32 %v1053_v7, %v781_v9  ;;  %v782_v52 = vadd.f32 %v750_v21, %v475_v62  ;;  %v820_v53 = vmul.f32 %v2065_v6, %v2254_v42  ;;  %v856_v63 = vmul.f32 %v2074_v38, %v2305_v57 }
  0xc1   : > { %v652_v1 = vadd.f32 %v621_v0, %v584_v16  ;;  %v653_v2 = vadd.f32 %v621_v0, %v585_v12  ;;  %v857_v35 = vmul.f32 %v2074_v38, %v2327_v56  ;;  %v925_v5 = vmul.f32 0.0, %v2085_v28 }
  0xc2   : > { %1118 = vst.msk [vmem:[%s1485_s19 + $0xe0] sm:$0xff] %vm1089_vm3, %v1085_v49  ;;  %v1086_v3 = vadd.f32 %v1007_v46, %v782_v52  ;;  %v888_v8 = vadd.f32 %v856_v63, %v819_v59  ;;  %v301_v23 = vmul.f32 %v2094_v33, %v2254_v42  ;;  %v339_v6 = vmul.f32 %v1420_v18, %v2327_v56 }
  0xc3   : > { %v476_v24 = vadd.f32 %v2142_v50, %v438_v22  ;;  %v671_v57 = vrot.slane %v652_v1, 1  ;;  %v687_v25 = vrot.slane %v653_v2, 1  ;;  %v889_v26 = vadd.f32 %v857_v35, %v820_v53 }
  0xc4   : > { %1119 = vst.msk [vmem:[%s1485_s19 + $0xe8] sm:$0xff] %vm1089_vm3, %v1086_v3  ;;  %v956_v38 = vadd.f32 %v925_v5, %v888_v8  ;;  %v371_v27 = vadd.f32 %v339_v6, %v301_v23 }
  0xc5   : > { %v704_v28 = vsel %vm688_vm0, %v671_v57, %v687_v25  ;;  %v957_v44 = vadd.f32 %v925_v5, %v889_v26  ;;  %v720_v33 = vsel %vm688_vm0, %v687_v25, %v671_v57 }
  0xc6   : > { %v975_v42 = vrot.slane %v956_v38, 7  ;;  %v439_v18 = vadd.f32 %v407_v43, %v371_v27  ;;  %v783_v56 = vadd.f32 %v704_v28, %v476_v24  ;;  %v752_v45 = vsel %vm655_vm4, %v720_v33, 0.0 }
  0xc7   : > { %v991_v29 = vrot.slane %v957_v44, 7 }
  0xc8   : > { %v477_v41 = vadd.f32 %v2142_v50, %v439_v18 }
  0xc9   : > { %v1024_v13 = vsel %vm992_vm2, %v991_v29, %v975_v42  ;;  %v1008_v30 = vsel %vm992_vm2, %v975_v42, %v991_v29 }
  0xca   : > { %v1055_v37 = vsel %vm958_vm1, %v1024_v13, 0.0  ;;  %v784_v10 = vadd.f32 %v752_v45, %v477_v41 }
  0xcb   : > { %v1087_v31 = vadd.f32 %v1055_v37, %v783_v56 }
  0xcc   : > { %v1088_v32 = vadd.f32 %v1008_v30, %v784_v10 }
  0xcd   : > { %1120 = vst.msk [vmem:[%s1485_s19 + $0xf0] sm:$0xff] %vm1089_vm3, %v1087_v31 }
  0xce   : > { %1121 = vst.msk [vmem:[%s1485_s19 + $0xf8] sm:$0xff] %vm1089_vm3, %v1088_v32 }
  0xcf PF: > { %s13_s14 = sadd.s32 1, %s1312_s14   ;;  %s2429_s12 = smov %s1308_s13 }
  0xd0   : > { %p10_p5 = scmp.ge.s32.totalorder %s13_s14, 4   ;;  %s2430_s13 = smov %s2432_s15 }
  0xd2   :  { %12 = sbr.rel (!%p10_p5) target bundleno = 2 (0x2), region = 68 }

</bundles_post_ra>
